<compile_context>
chip_gen: v7x
topology: tpu7x:2x2x1
jax: 0.10.0
libtpu: 0.0.40
codegen_flags: <defaults>
</compile_context>

<pallas_src>
import jax
import jax.numpy as jnp
from jax.experimental import pallas as pl
from jax.experimental.pallas import tpu as pltpu


LANE = 128       # vreg lane width (v5e / v6e / v7x)
MXU_W = 256      # MXU tile width on v6e/v7x (multiple of 128, so fine on v5e)
K_TILE = 1024    # d_in tile (multiple of 128); fewer grid steps than 256


def _round_up(v, m):
    return ((v + m - 1) // m) * m


# ----------------------------------------------------------------------------
# Kernel factory:  feat   = x @ Wb + bb      (K-tiled, f32 VMEM accumulator)
#                  logits = feat @ Wc + bc   (lane-dense padded feat/classes)
#                  loss   = sum(feat^2) / (N_true * feat_dim_true)   [train only]
# ----------------------------------------------------------------------------
def _make_kernel(n_true, row_tile, feat_dim_true, compute_loss):
    inv = 1.0 / float(n_true * feat_dim_true)

    def kernel(x_ref, wb_ref, bb_ref, wc_ref, bc_ref, logits_ref, *rest):
        if compute_loss:
            loss_ref, acc_ref = rest
        else:
            (acc_ref,) = rest

        r = pl.program_id(0)                 # row-block axis ("parallel")
        k = pl.program_id(1)                 # d_in reduction axis ("arbitrary")

        @pl.when(k == 0)
        def _init():
            # Seed the accumulator with the backbone bias (saves the add later).
            acc_ref[...] = jnp.broadcast_to(bb_ref[...], acc_ref.shape)

        # Backbone partial matmul over this K tile: in-kernel bf16 cast of the
        # f32 x tile (VPU slot, hidden under the MXU), f32 accumulation.
        acc_ref[...] += jnp.dot(x_ref[...].astype(jnp.bfloat16), wb_ref[...],
                                preferred_element_type=jnp.float32)

        @pl.when(k == pl.num_programs(1) - 1)
        def _finalize():
            feat = acc_ref[...]                               # (row_tile, feat_p) f32
            logits = jnp.dot(feat.astype(jnp.bfloat16), wc_ref[...],
                             preferred_element_type=jnp.float32) + bc_ref[...]
            logits_ref[...] = logits.astype(logits_ref.dtype)  # lane-dense store
            if compute_loss:
                # Mask rows padded beyond the true batch size; padded feat
                # columns are exactly zero (zero-padded Wb / bb) so they add 0.
                row_ids = (r * row_tile
                           + jax.lax.broadcasted_iota(jnp.int32, feat.shape, 0))
                sq = jnp.where(row_ids < n_true, feat * feat, 0.0)
                part = jnp.sum(sq) * inv
                loss_ref[...] = jnp.broadcast_to(part, loss_ref.shape)

    return kernel


# ----------------------------------------------------------------------------
# One-time parameter preparation (cached padded bf16 weights) — per review,
# this traffic must NOT happen on every forward call.
# ----------------------------------------------------------------------------
def prepare_params(raw, k_tile=K_TILE):
    wb, bb, wc, bc = raw["wb"], raw["bb"], raw["wc"], raw["bc"]
    d_in, feat_dim = wb.shape
    num_class = wc.shape[1]

    d_in_p = _round_up(d_in, k_tile)
    feat_p = _round_up(feat_dim, MXU_W)
    c_p = _round_up(num_class, MXU_W)

    wb_p = jnp.pad(wb, ((0, d_in_p - d_in), (0, feat_p - feat_dim))).astype(jnp.bfloat16)
    bb_p = jnp.pad(bb, ((0, 0), (0, feat_p - feat_dim)))                     # f32
    wc_p = jnp.pad(wc, ((0, feat_p - feat_dim), (0, c_p - num_class))).astype(jnp.bfloat16)
    bc_p = jnp.pad(bc, ((0, 0), (0, c_p - num_class)))                       # f32

    return {
        "wb": wb_p, "bb": bb_p, "wc": wc_p, "bc": bc_p,
        "d_in": d_in, "feat_dim": feat_dim, "num_class": num_class,
        "d_in_p": d_in_p, "feat_p": feat_p, "c_p": c_p, "k_tile": k_tile,
    }


def codaprompt_forward(x_nchw, p, train=True):
    """x_nchw: (N, C, H, W) float32. Returns (logits, loss) if train else logits."""
    N = x_nchw.shape[0]
    d_in, d_in_p = p["d_in"], p["d_in_p"]
    feat_p, c_p, k_tile = p["feat_p"], p["c_p"], p["k_tile"]
    feat_dim, num_class = p["feat_dim"], p["num_class"]

    # ---- per-call layout glue (x only; weights are pre-padded/cast) --------
    x_flat = x_nchw.reshape(N, -1)                       # NCHW -> (N, C*H*W), f32
    assert x_flat.shape[1] == d_in
    if d_in_p != d_in:
        x_flat = jnp.pad(x_flat, ((0, 0), (0, d_in_p - d_in)))

    # Row tiling: sublane-aligned, capped at 128 rows per block so the row axis
    # can be sharded across v7x's two TensorCores.
    row_tile = min(128, _round_up(N, 8))
    n_pad = _round_up(N, row_tile)
    if n_pad != N:
        x_flat = jnp.pad(x_flat, ((0, n_pad - N), (0, 0)))   # zero rows, masked below
    n_rows = n_pad // row_tile
    n_k = d_in_p // k_tile

    kernel = _make_kernel(N, row_tile, feat_dim, compute_loss=train)

    logits_shape = jax.ShapeDtypeStruct((n_pad, c_p), jnp.float32)
    logits_spec = pl.BlockSpec((row_tile, c_p), lambda r, k: (r, 0))
    if train:
        # One lane-dense (8,128) partial-loss tile per row block (megacore safe).
        out_shape = (logits_shape,
                     jax.ShapeDtypeStruct((n_rows, 8, LANE), jnp.float32))
        out_specs = (logits_spec,
                     pl.BlockSpec((1, 8, LANE), lambda r, k: (r, 0, 0)))
    else:
        out_shape = logits_shape
        out_specs = logits_spec

    # Deeper pipelining on the streamed operands only when the K grid is deep.
    def _streamed(shape, index_map):
        if n_k >= 3:
            return pl.BlockSpec(shape, index_map, pipeline_mode=pl.Buffered(3))
        return pl.BlockSpec(shape, index_map)

    # VMEM budget: streamed x (f32) + Wb (bf16) tiles (<=3 buffers), resident
    # Wc / biases / logits / loss tile (double-buffered), acc scratch.
    # TODO(synk): verify in MLIR that the constant-index resident operands are
    # single-buffered on v7x; shrink manually if not.
    est = (3 * row_tile * k_tile * 4
           + 3 * k_tile * feat_p * 2
           + 2 * feat_p * c_p * 2
           + 2 * row_tile * c_p * 4
           + 2 * 8 * feat_p * 4 + 2 * 8 * c_p * 4
           + 2 * 8 * LANE * 4
           + row_tile * feat_p * 4)
    vmem_limit = int(min(96 * 1024 * 1024, max(2 * est, 16 * 1024 * 1024)))

    cost = pl.CostEstimate(
        flops=2 * n_pad * d_in_p * feat_p + 2 * n_pad * feat_p * c_p,
        transcendentals=0,
        bytes_accessed=(x_flat.size * 4 + p["wb"].size * 2 + p["wc"].size * 2
                        + p["bb"].size * 4 + p["bc"].size * 4 + n_pad * c_p * 4),
    )

    outs = pl.pallas_call(
        kernel,
        out_shape=out_shape,
        grid=(n_rows, n_k),
        in_specs=[
            _streamed((row_tile, k_tile), lambda r, k: (r, k)),      # x tile (f32)
            _streamed((k_tile, feat_p), lambda r, k: (k, 0)),        # Wb tile (bf16)
            pl.BlockSpec((1, feat_p), lambda r, k: (0, 0)),          # bb (resident)
            pl.BlockSpec((feat_p, c_p), lambda r, k: (0, 0)),        # Wc (resident)
            pl.BlockSpec((1, c_p), lambda r, k: (0, 0)),             # bc (resident)
        ],
        out_specs=out_specs,
        scratch_shapes=[pltpu.VMEM((row_tile, feat_p), jnp.float32)],  # feat acc
        compiler_params=pltpu.CompilerParams(
            dimension_semantics=("parallel", "arbitrary"),  # rows ∥, K = reduction
            vmem_limit_bytes=vmem_limit,
        ),
        cost_estimate=cost,
    )(x_flat, p["wb"], p["bb"], p["wc"], p["bc"])

    if train:
        logits_p, loss_parts = outs
        logits = logits_p[:N, :num_class]        # drop padded rows / zero columns
        loss = jnp.sum(loss_parts[:, 0, 0])      # tiny (n_rows,) reduction
        return logits, loss
    logits_p = outs
    return logits_p[:N, :num_class]


# ----------------------------------------------------------------------------
# Deterministic raw parameter init (shapes implied by the module __init__)
# ----------------------------------------------------------------------------
def init_params(key, d_in, feat_dim, num_class):
    k1, k2, k3, k4 = jax.random.split(key, 4)
    # backbone linear (synthetic stand-in for the prompt ViT backbone)
    wb = jax.random.normal(k1, (d_in, feat_dim), jnp.float32) * (1.0 / jnp.sqrt(d_in))
    bb = jax.random.normal(k2, (1, feat_dim), jnp.float32) * 0.01
    # classifier = nn.Linear(feat_dim, num_class)  (stored transposed: x @ Wc + bc)
    wc = jax.random.normal(k3, (feat_dim, num_class), jnp.float32) * (1.0 / jnp.sqrt(feat_dim))
    bc = jax.random.normal(k4, (1, num_class), jnp.float32) * 0.01
    return {"wb": wb, "bb": bb, "wc": wc, "bc": bc}


if __name__ == "__main__":
    # Small shapes consistent with the forward: batch=2, C=4, H=W=16,
    # feat_dim=32, num_class=10.
    N, C, H, W = 2, 4, 16, 16
    feat_dim, num_class = 32, 10
    d_in = C * H * W

    key = jax.random.PRNGKey(0)
    kx, kp = jax.random.split(key)
    x = jax.random.normal(kx, (N, C, H, W), jnp.float32)
    raw = init_params(kp, d_in, feat_dim, num_class)
    params = prepare_params(raw)          # one-time padded bf16 weight cache

    # train=True path: (logits, loss)
    logits, loss = codaprompt_forward(x, params, train=True)
    logits = jax.block_until_ready(logits)
    loss = jax.block_until_ready(loss)

    # eval path: logits only (loss-free kernel variant)
    logits_eval = jax.block_until_ready(codaprompt_forward(x, params, train=False))

    # Reference with the same bf16-on-MXU numerics as the kernel (tight check).
    x_flat = x.reshape(N, d_in)
    feat_ref = jnp.dot(x_flat.astype(jnp.bfloat16),
                       raw["wb"].astype(jnp.bfloat16),
                       preferred_element_type=jnp.float32) + raw["bb"]
    logits_ref = jnp.dot(feat_ref.astype(jnp.bfloat16),
                         raw["wc"].astype(jnp.bfloat16),
                         preferred_element_type=jnp.float32) + raw["bc"]
    loss_ref = jnp.mean(feat_ref * feat_ref)
    assert jnp.allclose(logits, logits_ref, atol=2e-2, rtol=2e-2)
    assert jnp.allclose(logits_eval, logits_ref, atol=2e-2, rtol=2e-2)
    assert jnp.allclose(loss, loss_ref, atol=2e-2, rtol=2e-2)

    # Coarse sanity vs. the full-f32 math of the original module.
    feat_f32 = x_flat @ raw["wb"] + raw["bb"]
    logits_f32 = feat_f32 @ raw["wc"] + raw["bc"]
    assert jnp.allclose(logits, logits_f32, atol=1e-1, rtol=1e-1)

    print("KERNEL_OK")
</pallas_src>

<mosaic_0001>
module attributes {stable_mosaic.version = 11 : i64} {
  func.func @kernel(%arg0: i32, %arg1: i32, %arg2: memref<8x1024xf32, #tpu.memory_space<vmem>>, %arg3: memref<1024x256xbf16, #tpu.memory_space<vmem>>, %arg4: memref<1x256xf32, #tpu.memory_space<vmem>>, %arg5: memref<256x256xbf16, #tpu.memory_space<vmem>>, %arg6: memref<1x256xf32, #tpu.memory_space<vmem>>, %arg7: memref<8x256xf32, #tpu.memory_space<vmem>>, %arg8: memref<1x8x128xf32, #tpu.memory_space<vmem>>, %arg9: memref<8x256xf32, #tpu.memory_space<vmem>>) attributes {dimension_semantics = [#tpu.dimension_semantics<parallel>, #tpu.dimension_semantics<arbitrary>], iteration_bounds = array<i64: 1, 1>, scalar_prefetch = 0 : i64, scratch_operands = 1 : i64, tpu.core_type = #tpu.core_type<tc>, window_params = [{transform_indices = @transform_0, window_bounds = array<i64: 8, 1024>}, {transform_indices = @transform_1, window_bounds = array<i64: 1024, 256>}, {pipeline_mode = #tpu.pipeline_mode<synchronous>, transform_indices = @transform_2, window_bounds = array<i64: 1, 256>}, {pipeline_mode = #tpu.pipeline_mode<synchronous>, transform_indices = @transform_3, window_bounds = array<i64: 256, 256>}, {pipeline_mode = #tpu.pipeline_mode<synchronous>, transform_indices = @transform_4, window_bounds = array<i64: 1, 256>}, {transform_indices = @transform_5, window_bounds = array<i64: 8, 256>}, {transform_indices = @transform_6, window_bounds = array<i64: 1, 8, 128>}]} {
    %c0_i32 = arith.constant 0 : i32
    %0 = arith.cmpi eq, %arg1, %c0_i32 : i32
    %1 = arith.extui %0 : i1 to i32
    %c0_i32_0 = arith.constant 0 : i32
    %2 = arith.cmpi ne, %1, %c0_i32_0 : i32
    scf.if %2 {
      %c0_10 = arith.constant 0 : index
      %c0_11 = arith.constant 0 : index
      %13 = vector.load %arg4[%c0_10, %c0_11] : memref<1x256xf32, #tpu.memory_space<vmem>>, vector<1x256xf32>
      %14 = vector.shape_cast %13 : vector<1x256xf32> to vector<1x256xf32>
      %15 = vector.broadcast %14 : vector<1x256xf32> to vector<8x256xf32>
      %c0_12 = arith.constant 0 : index
      %c0_13 = arith.constant 0 : index
      %16 = vector.load %arg9[%c0_12, %c0_13] : memref<8x256xf32, #tpu.memory_space<vmem>>, vector<8x256xf32>
      tpu.vector_store %arg9[%c0_12, %c0_13], %15 {strides = array<i32>} : memref<8x256xf32, #tpu.memory_space<vmem>>, vector<8x256xf32>,
    } else {
    }
    %c0 = arith.constant 0 : index
    %c0_1 = arith.constant 0 : index
    %3 = vector.load %arg9[%c0, %c0_1] : memref<8x256xf32, #tpu.memory_space<vmem>>, vector<8x256xf32>
    %c0_2 = arith.constant 0 : index
    %c0_3 = arith.constant 0 : index
    %4 = vector.load %arg2[%c0_2, %c0_3] : memref<8x1024xf32, #tpu.memory_space<vmem>>, vector<8x1024xf32>
    %5 = arith.truncf %4 : vector<8x1024xf32> to vector<8x1024xbf16>
    %c0_4 = arith.constant 0 : index
    %c0_5 = arith.constant 0 : index
    %6 = vector.load %arg3[%c0_4, %c0_5] : memref<1024x256xbf16, #tpu.memory_space<vmem>>, vector<1024x256xbf16>
    %cst = arith.constant dense<0.000000e+00> : vector<8x256xf32>
    %7 = tpu.matmul %5, %6, %cst {dimension_numbers = #tpu.dot_dimension_numbers<[1], [0], [0], [1], [0, 0, 1, 1], [], []>} : vector<8x1024xbf16>, vector<1024x256xbf16>, vector<8x256xf32> -> vector<8x256xf32>
    %8 = arith.addf %3, %7 : vector<8x256xf32>
    %c0_6 = arith.constant 0 : index
    %c0_7 = arith.constant 0 : index
    %9 = vector.load %arg9[%c0_6, %c0_7] : memref<8x256xf32, #tpu.memory_space<vmem>>, vector<8x256xf32>
    tpu.vector_store %arg9[%c0_6, %c0_7], %8 {strides = array<i32>} : memref<8x256xf32, #tpu.memory_space<vmem>>, vector<8x256xf32>,
    %c0_i32_8 = arith.constant 0 : i32
    %10 = arith.cmpi eq, %arg1, %c0_i32_8 : i32
    %11 = arith.extui %10 : i1 to i32
    %c0_i32_9 = arith.constant 0 : i32
    %12 = arith.cmpi ne, %11, %c0_i32_9 : i32
    scf.if %12 {
      %c0_10 = arith.constant 0 : index
      %c0_11 = arith.constant 0 : index
      %13 = vector.load %arg9[%c0_10, %c0_11] : memref<8x256xf32, #tpu.memory_space<vmem>>, vector<8x256xf32>
      %14 = arith.truncf %13 : vector<8x256xf32> to vector<8x256xbf16>
      %c0_12 = arith.constant 0 : index
      %c0_13 = arith.constant 0 : index
      %15 = vector.load %arg5[%c0_12, %c0_13] : memref<256x256xbf16, #tpu.memory_space<vmem>>, vector<256x256xbf16>
      %cst_14 = arith.constant dense<0.000000e+00> : vector<8x256xf32>
      %16 = tpu.matmul %14, %15, %cst_14 {dimension_numbers = #tpu.dot_dimension_numbers<[1], [0], [0], [1], [0, 0, 1, 1], [], []>} : vector<8x256xbf16>, vector<256x256xbf16>, vector<8x256xf32> -> vector<8x256xf32>
      %c0_15 = arith.constant 0 : index
      %c0_16 = arith.constant 0 : index
      %17 = vector.load %arg6[%c0_15, %c0_16] : memref<1x256xf32, #tpu.memory_space<vmem>>, vector<1x256xf32>
      %18 = vector.broadcast %17 : vector<1x256xf32> to vector<8x256xf32>
      %19 = arith.addf %16, %18 : vector<8x256xf32>
      %c0_17 = arith.constant 0 : index
      %c0_18 = arith.constant 0 : index
      %20 = vector.load %arg7[%c0_17, %c0_18] : memref<8x256xf32, #tpu.memory_space<vmem>>, vector<8x256xf32>
      tpu.vector_store %arg7[%c0_17, %c0_18], %19 {strides = array<i32>} : memref<8x256xf32, #tpu.memory_space<vmem>>, vector<8x256xf32>,
      %c8_i32 = arith.constant 8 : i32
      %21 = arith.muli %arg0, %c8_i32 : i32
      %22 = tpu.iota {dimensions = array<i32: 0>} : vector<8x256xi32>
      %23 = vector.broadcast %21 : i32 to vector<8x256xi32>
      %24 = arith.addi %23, %22 : vector<8x256xi32>
      %c2_i32 = arith.constant 2 : i32
      %25 = vector.broadcast %c2_i32 : i32 to vector<8x256xi32>
      %26 = arith.cmpi slt, %24, %25 : vector<8x256xi32>
      %27 = arith.mulf %13, %13 : vector<8x256xf32>
      %cst_19 = arith.constant 0.000000e+00 : f32
      %28 = vector.broadcast %cst_19 : f32 to vector<8x256xf32>
      %29 = arith.select %26, %27, %28 : vector<8x256xi1>, vector<8x256xf32>
      %30 = vector.shape_cast %29 : vector<8x256xf32> to vector<1x8x256xf32>
      %cst_20 = arith.constant dense<0.000000e+00> : vector<1xf32>
      %31 = vector.multi_reduction <add>, %30, %cst_20 [1, 2] : vector<1x8x256xf32> to vector<1xf32>
      %32 = vector.shape_cast %31 : vector<1xf32> to vector<1x1x1xf32>
      %33 = vector.extract %32[0, 0, 0] : f32 from vector<1x1x1xf32>
      %cst_21 = arith.constant 1.562500e-02 : f32
      %34 = arith.mulf %33, %cst_21 : f32
      %35 = vector.broadcast %34 : f32 to vector<1x8x128xf32>
      %c0_22 = arith.constant 0 : index
      %c0_23 = arith.constant 0 : index
      %c0_24 = arith.constant 0 : index
      %36 = vector.load %arg8[%c0_22, %c0_23, %c0_24] : memref<1x8x128xf32, #tpu.memory_space<vmem>>, vector<1x8x128xf32>
      tpu.vector_store %arg8[%c0_22, %c0_23, %c0_24], %35 {strides = array<i32>} : memref<1x8x128xf32, #tpu.memory_space<vmem>>, vector<1x8x128xf32>,
    } else {
    }
    return
  }
  func.func @transform_0(%arg0: i32, %arg1: i32) -> (i32, i32) {
    %c0_i32 = arith.constant 0 : i32
    return %arg0, %arg1 : i32, i32
  }
  func.func @transform_1(%arg0: i32, %arg1: i32) -> (i32, i32) {
    %c0_i32 = arith.constant 0 : i32
    %c0_i32_0 = arith.constant 0 : i32
    return %arg1, %c0_i32 : i32, i32
  }
  func.func @transform_2(%arg0: i32, %arg1: i32) -> (i32, i32) {
    %c0_i32 = arith.constant 0 : i32
    %c0_i32_0 = arith.constant 0 : i32
    %c0_i32_1 = arith.constant 0 : i32
    return %c0_i32, %c0_i32_0 : i32, i32
  }
  func.func @transform_3(%arg0: i32, %arg1: i32) -> (i32, i32) {
    %c0_i32 = arith.constant 0 : i32
    %c0_i32_0 = arith.constant 0 : i32
    %c0_i32_1 = arith.constant 0 : i32
    return %c0_i32, %c0_i32_0 : i32, i32
  }
  func.func @transform_4(%arg0: i32, %arg1: i32) -> (i32, i32) {
    %c0_i32 = arith.constant 0 : i32
    %c0_i32_0 = arith.constant 0 : i32
    %c0_i32_1 = arith.constant 0 : i32
    return %c0_i32, %c0_i32_0 : i32, i32
  }
  func.func @transform_5(%arg0: i32, %arg1: i32) -> (i32, i32) {
    %c0_i32 = arith.constant 0 : i32
    %c0_i32_0 = arith.constant 0 : i32
    return %arg0, %c0_i32 : i32, i32
  }
  func.func @transform_6(%arg0: i32, %arg1: i32) -> (i32, i32, i32) {
    %c0_i32 = arith.constant 0 : i32
    %c0_i32_0 = arith.constant 0 : i32
    %c0_i32_1 = arith.constant 0 : i32
    return %arg0, %c0_i32, %c0_i32_0 : i32, i32, i32
  }
}

</mosaic_0001>

<bundles_post_ra>
// kernel: tpu_custom_call.1
= control target key start
LH: loop header
LB: loop body
LE: loop exit
PB: predicated region body
PF: predicated region fallthrough
CT: control target
= control target key end

     0   :  { %12 = vsyncpa [#allocation4], 0  ;;  %s1983_s0 = inlined_call_operand.hbm [shape: f32[8,1024], index: 0, kind: input, shape index: {}]   ;;  %s1984_s1 = inlined_call_operand.hbm [shape: bf16[1024,256], index: 1, kind: input, shape index: {}]   ;;  %s1985_s2 = inlined_call_operand.vmem [shape: f32[1,256], index: 2, kind: input, shape index: {}]   ;;  %s1986_s3 = inlined_call_operand.hbm [shape: bf16[256,256], index: 3, kind: input, shape index: {}]   ;;  %s1987_s4 = inlined_call_operand.vmem [shape: f32[1,256], index: 4, kind: input, shape index: {}]   ;;  %s1988_s5 = inlined_call_operand.hbm [shape: f32[8,256], index: 5, kind: output, shape index: {0}]   ;;  %s1989_s6 = inlined_call_operand.hbm [shape: f32[1,8,128], index: 6, kind: output, shape index: {1}]  }
   0x1   :  { %13 = vsyncpa [#allocation7], 0 }
   0x2   :  { %14 = vsyncpa [#allocation5], 0 }
   0x3   :  { %15 = vsyncpa [#allocation11], 0  ;;  %s1869_s21 = smov [#allocation6]   ;;  %s1751_s25 = scalar_lea.hbm %s1984_s1, 16384 }
   0x4   :  { %s31_s22 = sshll.u32 %s1869_s21, 4  ;;  %p1752_p0 = scmp.ne.s32.totalorder %s1984_s1, %s1751_s25  ;;  %s32_s22 = int_to_ptr.vmem [resolvable:$true] %s31_s22 }
   0x5   :  { %p1755_p1 = scmp.lt.u32.totalorder %s1751_s25, %s1984_s1 }
   0x7   :  { %p1757_p2 = pnand %p1755_p1, %p1752_p0 }
   0x9   :  { %1760 = shalt.err (!%p1757_p2)
}
   0xa   :  { %s1761_s30 = scalar_lea.vmem %s32_s22, 16384  ;;  %p1766_p4 = scmp.lt.s32.totalorder %s32_s22, %s32_s22 }
   0xb   :  { %p1762_p3 = scmp.ne.s32.totalorder %s32_s22, %s1761_s30  ;;  %p1767_p5 = scmp.lt.s32.totalorder %s1761_s30, %s1761_s30 }
   0xd   :  { %p1768_p6 = por %p1767_p5, %p1766_p4 }
   0xf   :  { %p1769_p7 = pnand %p1768_p6, %p1762_p3 }
  0x11   :  { %1772 = shalt.err (!%p1769_p7)
}
  0x12   :  { %s1870_s7 = smov 128   ;;  %s1871_s8 = smov 8  }
  0x13   :  { %37 = dma.hbm_to_vmem [thread:$0]  %s1984_s1, 16384, %s32_s22, [#allocation7], %s1870_s7, %s1870_s7, %s1871_s8  }
  0x14   :  { %s1872_s11 = smov [#allocation3]   ;;  %s1873_s13 = smov [#allocation8]  }
  0x15   :  { %s22_s12 = sshll.u32 %s1872_s11, 4  ;;  %s45_s14 = sshll.u32 %s1873_s13, 4  ;;  %s23_s12 = int_to_ptr.vmem [resolvable:$true] %s22_s12  ;;  %s46_s14 = int_to_ptr.vmem [resolvable:$true] %s45_s14 }
  0x16   :  { %s1773_s17 = scalar_lea.hbm %s1983_s0, 1024 }
  0x17   :  { %p1774_p8 = scmp.ne.s32.totalorder %s1983_s0, %s1773_s17  ;;  %p1777_p9 = scmp.lt.u32.totalorder %s1773_s17, %s1983_s0 }
  0x19   :  { %p1779_p10 = pnand %p1777_p9, %p1774_p8 }
  0x1b   :  { %1782 = shalt.err (!%p1779_p10)
}
  0x1c   :  { %s1783_s1 = scalar_lea.vmem %s23_s12, 1024  ;;  %p1788_p12 = scmp.lt.s32.totalorder %s23_s12, %s23_s12 }
  0x1d   :  { %p1784_p11 = scmp.ne.s32.totalorder %s23_s12, %s1783_s1  ;;  %p1789_p13 = scmp.lt.s32.totalorder %s1783_s1, %s1783_s1 }
  0x1f   :  { %p1790_p0 = por %p1789_p13, %p1788_p12 }
  0x21   :  { %p1791_p1 = pnand %p1790_p0, %p1784_p11 }
  0x23   :  { %1794 = shalt.err (!%p1791_p1)
}
  0x24   :  { %25 = dma.hbm_to_vmem [thread:$0]  %s1983_s0, 1024, %s23_s12, [#allocation4]  }
  0x25   :  { %s1795_s26 = scalar_lea.hbm %s1986_s3, 4096 }
  0x26   :  { %p1796_p2 = scmp.ne.s32.totalorder %s1986_s3, %s1795_s26  ;;  %p1799_p3 = scmp.lt.u32.totalorder %s1795_s26, %s1986_s3 }
  0x28   :  { %p1801_p4 = pnand %p1799_p3, %p1796_p2 }
  0x2a   :  { %1804 = shalt.err (!%p1801_p4)
}
  0x2b   :  { %s1805_s9 = scalar_lea.vmem %s46_s14, 4096  ;;  %p1810_p6 = scmp.lt.s32.totalorder %s46_s14, %s46_s14 }
  0x2c   :  { %p1806_p5 = scmp.ne.s32.totalorder %s46_s14, %s1805_s9  ;;  %p1811_p7 = scmp.lt.s32.totalorder %s1805_s9, %s1805_s9 }
  0x2e   :  { %p1812_p8 = por %p1811_p7, %p1810_p6 }
  0x30   :  { %p1813_p9 = pnand %p1812_p8, %p1806_p5 }
  0x32   :  { %1816 = shalt.err (!%p1813_p9)
}
  0x33   :  { %51 = dma.hbm_to_vmem [thread:$0]  %s1986_s3, 4096, %s46_s14, [#allocation7], %s1870_s7, %s1870_s7, %s1871_s8  }
  0x34   :  { %1861 = dma.done.wait [#allocation4], 1024  }
  0x35   :  { %1862 = vsyncadd [#allocation4], 4294966272 }
  0x36   :  { %1863 = dma.done.wait [#allocation7], 20480  }
  0x37   :  { %1864 = vsyncadd [#allocation7], 4294946816  ;;  %v1511_v0 = vld [vmem:[#allocation6 + $0x4] ss:$8 sps:$4 sm:$0xff]   ;;  %v1515_v2 = vld [vmem:[#allocation6] ss:$8 sps:$4 sm:$0xff]  }
  0x38   :  { %v1513_v1 = vld [vmem:[#allocation6 + $0x104] ss:$8 sps:$4 sm:$0xff]   ;;  %867 = vmatprep.subr.bf16.mxu0 %v1511_v0  ;;  %v1516_v3 = vld [vmem:[#allocation6 + $0x100] ss:$8 sps:$4 sm:$0xff]   ;;  %v1517_v4 = vld [vmem:[#allocation6 + $0x14] ss:$8 sps:$4 sm:$0xff]  }
  0x39   :  { %908 = vmatprep.subr.bf16.mxu1 %v1513_v1  ;;  %868 = vmatpush1.bf16.msra.mxu0 %v1515_v2  ;;  %v1519_v5 = vld [vmem:[#allocation6 + $0x114] ss:$8 sps:$4 sm:$0xff]   ;;  %v1521_v6 = vld [vmem:[#allocation6 + $0x10] ss:$8 sps:$4 sm:$0xff]   ;;  %v1523_v8 = vld [vmem:[#allocation6 + $0x24] ss:$8 sps:$4 sm:$0xff]  }
  0x3a   :  { %909 = vmatpush1.bf16.msra.mxu1 %v1516_v3  ;;  %869 = vmatprep.subr.bf16.mxu0 %v1517_v4  ;;  %v1522_v7 = vld [vmem:[#allocation6 + $0x110] ss:$8 sps:$4 sm:$0xff]   ;;  %v1525_v9 = vld [vmem:[#allocation6 + $0x124] ss:$8 sps:$4 sm:$0xff]   ;;  %v1527_v10 = vld [vmem:[#allocation6 + $0x20] ss:$8 sps:$4 sm:$0xff]  }
  0x3b   :  { %910 = vmatprep.subr.bf16.mxu1 %v1519_v5  ;;  %v1528_v11 = vld [vmem:[#allocation6 + $0x120] ss:$8 sps:$4 sm:$0xff]   ;;  %v1529_v12 = vld [vmem:[#allocation6 + $0x34] ss:$8 sps:$4 sm:$0xff]   ;;  %v1533_v14 = vld [vmem:[#allocation6 + $0x30] ss:$8 sps:$4 sm:$0xff]  }
  0x3c   :  { %v1531_v13 = vld [vmem:[#allocation6 + $0x134] ss:$8 sps:$4 sm:$0xff]   ;;  %v1534_v15 = vld [vmem:[#allocation6 + $0x130] ss:$8 sps:$4 sm:$0xff]   ;;  %v1535_v16 = vld [vmem:[#allocation6 + $0x44] ss:$8 sps:$4 sm:$0xff]  }
  0x3d   :  { %870 = vmatpush1.bf16.msra.mxu0 %v1521_v6  ;;  %v1537_v17 = vld [vmem:[#allocation6 + $0x144] ss:$8 sps:$4 sm:$0xff]   ;;  %v1539_v18 = vld [vmem:[#allocation6 + $0x40] ss:$8 sps:$4 sm:$0xff]   ;;  %v1541_v20 = vld [vmem:[#allocation6 + $0x54] ss:$8 sps:$4 sm:$0xff]  }
  0x3e   :  { %911 = vmatpush1.bf16.msra.mxu1 %v1522_v7  ;;  %871 = vmatprep.subr.bf16.mxu0 %v1523_v8  ;;  %v1540_v19 = vld [vmem:[#allocation6 + $0x140] ss:$8 sps:$4 sm:$0xff]   ;;  %v1543_v21 = vld [vmem:[#allocation6 + $0x154] ss:$8 sps:$4 sm:$0xff]   ;;  %v1545_v22 = vld [vmem:[#allocation6 + $0x50] ss:$8 sps:$4 sm:$0xff]  }
  0x3f   :  { %912 = vmatprep.subr.bf16.mxu1 %v1525_v9  ;;  %v1546_v23 = vld [vmem:[#allocation6 + $0x150] ss:$8 sps:$4 sm:$0xff]   ;;  %v1547_v24 = vld [vmem:[#allocation6 + $0x64] ss:$8 sps:$4 sm:$0xff]   ;;  %v1551_v26 = vld [vmem:[#allocation6 + $0x60] ss:$8 sps:$4 sm:$0xff]  }
  0x40   :  { %v1549_v25 = vld [vmem:[#allocation6 + $0x164] ss:$8 sps:$4 sm:$0xff]   ;;  %v1552_v27 = vld [vmem:[#allocation6 + $0x160] ss:$8 sps:$4 sm:$0xff]   ;;  %v1553_v28 = vld [vmem:[#allocation6 + $0x74] ss:$8 sps:$4 sm:$0xff]  }
  0x41   :  { %872 = vmatpush1.bf16.msra.mxu0 %v1527_v10  ;;  %v1555_v29 = vld [vmem:[#allocation6 + $0x174] ss:$8 sps:$4 sm:$0xff]   ;;  %v1557_v30 = vld [vmem:[#allocation6 + $0x70] ss:$8 sps:$4 sm:$0xff]   ;;  %v1559_v32 = vld [vmem:[#allocation6 + $0x84] ss:$8 sps:$4 sm:$0xff]  }
  0x42   :  { %913 = vmatpush1.bf16.msra.mxu1 %v1528_v11  ;;  %873 = vmatprep.subr.bf16.mxu0 %v1529_v12  ;;  %v1558_v31 = vld [vmem:[#allocation6 + $0x170] ss:$8 sps:$4 sm:$0xff]   ;;  %v1561_v33 = vld [vmem:[#allocation6 + $0x184] ss:$8 sps:$4 sm:$0xff]   ;;  %v1563_v34 = vld [vmem:[#allocation6 + $0x80] ss:$8 sps:$4 sm:$0xff]  }
  0x43   :  { %914 = vmatprep.subr.bf16.mxu1 %v1531_v13  ;;  %v1564_v35 = vld [vmem:[#allocation6 + $0x180] ss:$8 sps:$4 sm:$0xff]   ;;  %v1565_v36 = vld [vmem:[#allocation6 + $0x94] ss:$8 sps:$4 sm:$0xff]   ;;  %v1569_v38 = vld [vmem:[#allocation6 + $0x90] ss:$8 sps:$4 sm:$0xff]  }
  0x44   :  { %v1567_v37 = vld [vmem:[#allocation6 + $0x194] ss:$8 sps:$4 sm:$0xff]   ;;  %v1570_v39 = vld [vmem:[#allocation6 + $0x190] ss:$8 sps:$4 sm:$0xff]   ;;  %v1571_v40 = vld [vmem:[#allocation6 + $0xa4] ss:$8 sps:$4 sm:$0xff]  }
  0x45   :  { %874 = vmatpush1.bf16.msra.mxu0 %v1533_v14  ;;  %v1573_v41 = vld [vmem:[#allocation6 + $0x1a4] ss:$8 sps:$4 sm:$0xff]   ;;  %v1575_v42 = vld [vmem:[#allocation6 + $0xa0] ss:$8 sps:$4 sm:$0xff]   ;;  %v1577_v44 = vld [vmem:[#allocation6 + $0xb4] ss:$8 sps:$4 sm:$0xff]  }
  0x46   :  { %915 = vmatpush1.bf16.msra.mxu1 %v1534_v15  ;;  %875 = vmatprep.subr.bf16.mxu0 %v1535_v16  ;;  %v1576_v43 = vld [vmem:[#allocation6 + $0x1a0] ss:$8 sps:$4 sm:$0xff]   ;;  %v1579_v45 = vld [vmem:[#allocation6 + $0x1b4] ss:$8 sps:$4 sm:$0xff]   ;;  %v1581_v47 = vld [vmem:[#allocation6 + $0xb0] ss:$8 sps:$4 sm:$0xff]  }
  0x47   :  { %916 = vmatprep.subr.bf16.mxu1 %v1537_v17  ;;  %v84_v46 = vld [vmem:[#allocation3 + $0x8] sm:$0xff]  ;;  %v1582_v48 = vld [vmem:[#allocation6 + $0x1b0] ss:$8 sps:$4 sm:$0xff]   ;;  %v1589_v56 = vld [vmem:[#allocation6 + $0xd4] ss:$8 sps:$4 sm:$0xff]   ;;  %s1875_s15 = smov [#allocation9]  }
  0x48   :  { %v92_v49 = vpack.c.bf16 %v84_v46, %v84_v46  ;;  %v86_v50 = vld [vmem:[#allocation3 + $0x18] sm:$0xff]  ;;  %v1583_v51 = vld [vmem:[#allocation6 + $0xc4] ss:$8 sps:$4 sm:$0xff]   ;;  %v1587_v54 = vld [vmem:[#allocation6 + $0xc0] ss:$8 sps:$4 sm:$0xff]   ;;  %s1318_s16 = sshll.u32 %s1875_s15, 4  ;;  %s1319_s16 = int_to_ptr.vmem [resolvable:$true] %s1318_s16 }
  0x49   :  { %876 = vmatpush1.bf16.msra.mxu0 %v1539_v18  ;;  %v94_v52 = vpack.c.bf16 %v86_v50, %v86_v50  ;;  %v1585_v53 = vld [vmem:[#allocation6 + $0x1c4] ss:$8 sps:$4 sm:$0xff]   ;;  %v1588_v55 = vld [vmem:[#allocation6 + $0x1c0] ss:$8 sps:$4 sm:$0xff]   ;;  %v1591_v57 = vld [vmem:[#allocation6 + $0x1d4] ss:$8 sps:$4 sm:$0xff]  }
  0x4a   :  { %917 = vmatpush1.bf16.msra.mxu1 %v1540_v19  ;;  %877 = vmatprep.subr.bf16.mxu0 %v1541_v20  ;;  %v1593_v58 = vld [vmem:[#allocation6 + $0xd0] ss:$8 sps:$4 sm:$0xff]   ;;  %v1595_v60 = vld [vmem:[#allocation6 + $0xe4] ss:$8 sps:$4 sm:$0xff]   ;;  %v1599_v62 = vld [vmem:[#allocation6 + $0xe0] ss:$8 sps:$4 sm:$0xff]  }
  0x4b   :  { %918 = vmatprep.subr.bf16.mxu1 %v1543_v21  ;;  %899 = vmatprep.mubr.bf16.mxu0 %v92_v49  ;;  %v1594_v59 = vld [vmem:[#allocation6 + $0x1d0] ss:$8 sps:$4 sm:$0xff]   ;;  %v1597_v61 = vld [vmem:[#allocation6 + $0x1e4] ss:$8 sps:$4 sm:$0xff]   ;;  %v1600_v63 = vld [vmem:[#allocation6 + $0x1e0] ss:$8 sps:$4 sm:$0xff]  }
  0x4c   :  { %940 = vmatprep.mubr.bf16.mxu1 %v94_v52  ;;  %v1601_v0 = vld [vmem:[#allocation6 + $0xf4] ss:$8 sps:$4 sm:$0xff]   ;;  %v1605_v2 = vld [vmem:[#allocation6 + $0xf0] ss:$8 sps:$4 sm:$0xff]   ;;  %v83_v4 = vld [vmem:[#allocation3] sm:$0xff] }
  0x4d   :  { %878 = vmatpush1.bf16.msra.mxu0 %v1545_v22  ;;  %v1603_v1 = vld [vmem:[#allocation6 + $0x1f4] ss:$8 sps:$4 sm:$0xff]   ;;  %v1606_v3 = vld [vmem:[#allocation6 + $0x1f0] ss:$8 sps:$4 sm:$0xff]   ;;  %v1609_v6 = vld [vmem:[#allocation6 + $0x204] ss:$8 sps:$4 sm:$0xff]   ;;  %v91_v8 = vpack.c.bf16 %v83_v4, %v83_v4 }
  0x4e   :  { %919 = vmatpush1.bf16.msra.mxu1 %v1546_v23  ;;  %879 = vmatprep.subr.bf16.mxu0 %v1547_v24  ;;  %v85_v5 = vld [vmem:[#allocation3 + $0x10] sm:$0xff]  ;;  %v1612_v7 = vld [vmem:[#allocation6 + $0x304] ss:$8 sps:$4 sm:$0xff]   ;;  %v1607_v10 = vld [vmem:[#allocation6 + $0x200] ss:$8 sps:$4 sm:$0xff]  }
  0x4f   :  { %920 = vmatprep.subr.bf16.mxu1 %v1549_v25  ;;  %v93_v9 = vpack.c.bf16 %v85_v5, %v85_v5  ;;  %v1610_v11 = vld [vmem:[#allocation6 + $0x300] ss:$8 sps:$4 sm:$0xff]   ;;  %v1615_v12 = vld [vmem:[#allocation6 + $0x214] ss:$8 sps:$4 sm:$0xff]   ;;  %v1613_v14 = vld [vmem:[#allocation6 + $0x210] ss:$8 sps:$4 sm:$0xff]  }
  0x50   :  { %v1618_v13 = vld [vmem:[#allocation6 + $0x314] ss:$8 sps:$4 sm:$0xff]   ;;  %v1616_v15 = vld [vmem:[#allocation6 + $0x310] ss:$8 sps:$4 sm:$0xff]   ;;  %v1621_v16 = vld [vmem:[#allocation6 + $0x224] ss:$8 sps:$4 sm:$0xff]  }
  0x51   :  { %880 = vmatpush1.bf16.msra.mxu0 %v1551_v26  ;;  %v1624_v17 = vld [vmem:[#allocation6 + $0x324] ss:$8 sps:$4 sm:$0xff]   ;;  %v1619_v18 = vld [vmem:[#allocation6 + $0x220] ss:$8 sps:$4 sm:$0xff]   ;;  %v1627_v20 = vld [vmem:[#allocation6 + $0x234] ss:$8 sps:$4 sm:$0xff]  }
  0x52   :  { %921 = vmatpush1.bf16.msra.mxu1 %v1552_v27  ;;  %881 = vmatprep.subr.bf16.mxu0 %v1553_v28  ;;  %v1622_v19 = vld [vmem:[#allocation6 + $0x320] ss:$8 sps:$4 sm:$0xff]   ;;  %v1630_v21 = vld [vmem:[#allocation6 + $0x334] ss:$8 sps:$4 sm:$0xff]   ;;  %v1625_v22 = vld [vmem:[#allocation6 + $0x230] ss:$8 sps:$4 sm:$0xff]  }
  0x53   :  { %922 = vmatprep.subr.bf16.mxu1 %v1555_v29  ;;  %v1628_v23 = vld [vmem:[#allocation6 + $0x330] ss:$8 sps:$4 sm:$0xff]   ;;  %v1633_v24 = vld [vmem:[#allocation6 + $0x244] ss:$8 sps:$4 sm:$0xff]   ;;  %v1631_v26 = vld [vmem:[#allocation6 + $0x240] ss:$8 sps:$4 sm:$0xff]  }
  0x54   :  { %v1636_v25 = vld [vmem:[#allocation6 + $0x344] ss:$8 sps:$4 sm:$0xff]   ;;  %v1634_v27 = vld [vmem:[#allocation6 + $0x340] ss:$8 sps:$4 sm:$0xff]   ;;  %v1639_v28 = vld [vmem:[#allocation6 + $0x254] ss:$8 sps:$4 sm:$0xff]  }
  0x55   :  { %882 = vmatpush1.bf16.msra.mxu0 %v1557_v30  ;;  %v1642_v29 = vld [vmem:[#allocation6 + $0x354] ss:$8 sps:$4 sm:$0xff]   ;;  %v1637_v30 = vld [vmem:[#allocation6 + $0x250] ss:$8 sps:$4 sm:$0xff]   ;;  %v1655_v46 = vld [vmem:[#allocation6 + $0x280] ss:$8 sps:$4 sm:$0xff]  }
  0x56   :  { %923 = vmatpush1.bf16.msra.mxu1 %v1558_v31  ;;  %883 = vmatprep.subr.bf16.mxu0 %v1559_v32  ;;  %v1640_v31 = vld [vmem:[#allocation6 + $0x350] ss:$8 sps:$4 sm:$0xff]   ;;  %v1645_v32 = vld [vmem:[#allocation6 + $0x264] ss:$8 sps:$4 sm:$0xff]   ;;  %v1666_v49 = vld [vmem:[#allocation6 + $0x394] ss:$8 sps:$4 sm:$0xff]  }
  0x57   :  { %924 = vmatprep.subr.bf16.mxu1 %v1561_v33  ;;  %v1648_v33 = vld [vmem:[#allocation6 + $0x364] ss:$8 sps:$4 sm:$0xff]   ;;  %v1661_v50 = vld [vmem:[#allocation6 + $0x290] ss:$8 sps:$4 sm:$0xff]  }
  0x58   :  { %v1669_v52 = vld [vmem:[#allocation6 + $0x2a4] ss:$8 sps:$4 sm:$0xff]  }
  0x59   :  { %884 = vmatpush1.bf16.msra.mxu0 %v1563_v34  ;;  %v1643_v34 = vld [vmem:[#allocation6 + $0x260] ss:$8 sps:$4 sm:$0xff]   ;;  %v1693_v4 = vld [vmem:[#allocation6 + $0x2e4] ss:$8 sps:$4 sm:$0xff]  }
  0x5a   :  { %925 = vmatpush1.bf16.msra.mxu1 %v1564_v35  ;;  %885 = vmatprep.subr.bf16.mxu0 %v1565_v36  ;;  %v1646_v35 = vld [vmem:[#allocation6 + $0x360] ss:$8 sps:$4 sm:$0xff]   ;;  %v1696_v5 = vld [vmem:[#allocation6 + $0x3e4] ss:$8 sps:$4 sm:$0xff]  }
  0x5b   :  { %926 = vmatprep.subr.bf16.mxu1 %v1567_v37  ;;  %v88_v36 = vld [vmem:[#allocation3 + $0x28] sm:$0xff]  ;;  %v1651_v37 = vld [vmem:[#allocation6 + $0x274] ss:$8 sps:$4 sm:$0xff]  }
  0x5d   :  { %886 = vmatpush1.bf16.msra.mxu0 %v1569_v38  ;;  %v1654_v38 = vld [vmem:[#allocation6 + $0x374] ss:$8 sps:$4 sm:$0xff]  }
  0x5e   :  { %927 = vmatpush1.bf16.msra.mxu1 %v1570_v39  ;;  %887 = vmatprep.subr.bf16.mxu0 %v1571_v40  ;;  %v96_v39 = vpack.c.bf16 %v88_v36, %v88_v36  ;;  %v90_v40 = vld [vmem:[#allocation3 + $0x38] sm:$0xff]  ;;  %v1735_v36 = vld [vmem:[#allocation8 + $0xa4] ss:$8 sps:$4 sm:$0xff]  }
  0x5f   :  { %928 = vmatprep.subr.bf16.mxu1 %v1573_v41  ;;  %v98_v41 = vpack.c.bf16 %v90_v40, %v90_v40  ;;  %v1741_v40 = vld [vmem:[#allocation8 + $0xc4] ss:$8 sps:$4 sm:$0xff]  }
  0x61   :  { %888 = vmatpush1.bf16.msra.mxu0 %v1575_v42  ;;  %v1649_v42 = vld [vmem:[#allocation6 + $0x270] ss:$8 sps:$4 sm:$0xff]  }
  0x62   :  { %929 = vmatpush1.bf16.msra.mxu1 %v1576_v43  ;;  %889 = vmatprep.subr.bf16.mxu0 %v1577_v44  ;;  %v1652_v43 = vld [vmem:[#allocation6 + $0x370] ss:$8 sps:$4 sm:$0xff]   ;;  %v1657_v44 = vld [vmem:[#allocation6 + $0x284] ss:$8 sps:$4 sm:$0xff]  }
  0x63   :  { %930 = vmatprep.subr.bf16.mxu1 %v1579_v45  ;;  %v1660_v45 = vld [vmem:[#allocation6 + $0x384] ss:$8 sps:$4 sm:$0xff]  }
  0x65   :  { %890 = vmatpush1.bf16.msra.mxu0 %v1581_v47  ;;  %v1658_v47 = vld [vmem:[#allocation6 + $0x380] ss:$8 sps:$4 sm:$0xff]  }
  0x66   :  { %931 = vmatpush1.bf16.msra.mxu1 %v1582_v48  ;;  %891 = vmatprep.subr.bf16.mxu0 %v1583_v51  ;;  %v1663_v48 = vld [vmem:[#allocation6 + $0x294] ss:$8 sps:$4 sm:$0xff]   ;;  %v1664_v51 = vld [vmem:[#allocation6 + $0x390] ss:$8 sps:$4 sm:$0xff]  }
  0x67   :  { %932 = vmatprep.subr.bf16.mxu1 %v1585_v53  ;;  %v1672_v53 = vld [vmem:[#allocation6 + $0x3a4] ss:$8 sps:$4 sm:$0xff]  }
  0x69   :  { %892 = vmatpush1.bf16.msra.mxu0 %v1587_v54  ;;  %v1667_v54 = vld [vmem:[#allocation6 + $0x2a0] ss:$8 sps:$4 sm:$0xff]  }
  0x6a   :  { %933 = vmatpush1.bf16.msra.mxu1 %v1588_v55  ;;  %893 = vmatprep.subr.bf16.mxu0 %v1589_v56  ;;  %v1670_v55 = vld [vmem:[#allocation6 + $0x3a0] ss:$8 sps:$4 sm:$0xff]   ;;  %v1675_v56 = vld [vmem:[#allocation6 + $0x2b4] ss:$8 sps:$4 sm:$0xff]  }
  0x6b   :  { %934 = vmatprep.subr.bf16.mxu1 %v1591_v57  ;;  %v1678_v57 = vld [vmem:[#allocation6 + $0x3b4] ss:$8 sps:$4 sm:$0xff]  }
  0x6d   :  { %894 = vmatpush1.bf16.msra.mxu0 %v1593_v58  ;;  %v1673_v58 = vld [vmem:[#allocation6 + $0x2b0] ss:$8 sps:$4 sm:$0xff]  }
  0x6e   :  { %935 = vmatpush1.bf16.msra.mxu1 %v1594_v59  ;;  %895 = vmatprep.subr.bf16.mxu0 %v1595_v60  ;;  %v1676_v59 = vld [vmem:[#allocation6 + $0x3b0] ss:$8 sps:$4 sm:$0xff]   ;;  %v1681_v60 = vld [vmem:[#allocation6 + $0x2c4] ss:$8 sps:$4 sm:$0xff]  }
  0x6f   :  { %936 = vmatprep.subr.bf16.mxu1 %v1597_v61  ;;  %v1684_v61 = vld [vmem:[#allocation6 + $0x3c4] ss:$8 sps:$4 sm:$0xff]  }
  0x71   :  { %896 = vmatpush1.bf16.msra.mxu0 %v1599_v62  ;;  %v1679_v62 = vld [vmem:[#allocation6 + $0x2c0] ss:$8 sps:$4 sm:$0xff]  }
  0x72   :  { %937 = vmatpush1.bf16.msra.mxu1 %v1600_v63  ;;  %897 = vmatprep.subr.bf16.mxu0 %v1601_v0  ;;  %v1682_v63 = vld [vmem:[#allocation6 + $0x3c0] ss:$8 sps:$4 sm:$0xff]   ;;  %v1687_v0 = vld [vmem:[#allocation6 + $0x2d4] ss:$8 sps:$4 sm:$0xff]  }
  0x73   :  { %938 = vmatprep.subr.bf16.mxu1 %v1603_v1  ;;  %v1690_v1 = vld [vmem:[#allocation6 + $0x3d4] ss:$8 sps:$4 sm:$0xff]  }
  0x75   :  { %898 = vmatpush1.bf16.msra.mxu0 %v1605_v2  ;;  %v1685_v2 = vld [vmem:[#allocation6 + $0x2d0] ss:$8 sps:$4 sm:$0xff]  }
  0x76   :  { %939 = vmatpush1.bf16.msra.mxu1 %v1606_v3  ;;  %949 = vmatprep.subr.bf16.mxu0 %v1609_v6  ;;  %v1688_v3 = vld [vmem:[#allocation6 + $0x3d0] ss:$8 sps:$4 sm:$0xff]   ;;  %v1691_v6 = vld [vmem:[#allocation6 + $0x2e0] ss:$8 sps:$4 sm:$0xff]  }
  0x77   :  { %990 = vmatprep.subr.bf16.mxu1 %v1612_v7  ;;  %v1694_v7 = vld [vmem:[#allocation6 + $0x3e0] ss:$8 sps:$4 sm:$0xff]  }
  0x78   :  { %900 = vmatmul.mubr.bf16.vlgmr.msra.gmra.mrb[0].mxu0 %v91_v8  ;;  %v1699_v8 = vld [vmem:[#allocation6 + $0x2f4] ss:$8 sps:$4 sm:$0xff]  }
  0x79   :  { %941 = vmatmul.mubr.bf16.vlgmr.msra.gmra.mrb[0].mxu1 %v93_v9  ;;  %950 = vmatpush1.bf16.msra.mxu0 %v1607_v10  ;;  %v1702_v9 = vld [vmem:[#allocation6 + $0x3f4] ss:$8 sps:$4 sm:$0xff]   ;;  %v1697_v10 = vld [vmem:[#allocation6 + $0x2f0] ss:$8 sps:$4 sm:$0xff]  }
  0x7a   :  { %991 = vmatpush1.bf16.msra.mxu1 %v1610_v11  ;;  %951 = vmatprep.subr.bf16.mxu0 %v1615_v12  ;;  %v1700_v11 = vld [vmem:[#allocation6 + $0x3f0] ss:$8 sps:$4 sm:$0xff]   ;;  %v87_v12 = vld [vmem:[#allocation3 + $0x20] sm:$0xff] }
  0x7b   :  { %992 = vmatprep.subr.bf16.mxu1 %v1618_v13  ;;  %981 = vmatprep.mubr.bf16.mxu0 %v96_v39  ;;  %v89_v13 = vld [vmem:[#allocation3 + $0x30] sm:$0xff] }
  0x7c   :  { %1022 = vmatprep.mubr.bf16.mxu1 %v98_v41  ;;  %v1736_v39 = vld [vmem:[#allocation8 + $0xb0] ss:$8 sps:$4 sm:$0xff]   ;;  %v1739_v41 = vld [vmem:[#allocation8 + $0xc0] ss:$8 sps:$4 sm:$0xff]  }
  0x7d   :  { %952 = vmatpush1.bf16.msra.mxu0 %v1613_v14  ;;  %v95_v14 = vpack.c.bf16 %v87_v12, %v87_v12 }
  0x7e   :  { %993 = vmatpush1.bf16.msra.mxu1 %v1616_v15  ;;  %953 = vmatprep.subr.bf16.mxu0 %v1621_v16  ;;  %v97_v15 = vpack.c.bf16 %v89_v13, %v89_v13  ;;  %v1703_v16 = vld [vmem:[#allocation8] ss:$8 sps:$4 sm:$0xff]  }
  0x7f   :  { %994 = vmatprep.subr.bf16.mxu1 %v1624_v17  ;;  %v1705_v17 = vld [vmem:[#allocation8 + $0x4] ss:$8 sps:$4 sm:$0xff]  }
  0x81   :  { %954 = vmatpush1.bf16.msra.mxu0 %v1619_v18  ;;  %v1708_v18 = vld [vmem:[#allocation8 + $0x14] ss:$8 sps:$4 sm:$0xff]  }
  0x82   :  { %995 = vmatpush1.bf16.msra.mxu1 %v1622_v19  ;;  %955 = vmatprep.subr.bf16.mxu0 %v1627_v20  ;;  %v1706_v19 = vld [vmem:[#allocation8 + $0x10] ss:$8 sps:$4 sm:$0xff]   ;;  %v1711_v20 = vld [vmem:[#allocation8 + $0x24] ss:$8 sps:$4 sm:$0xff]  }
  0x83   :  { %996 = vmatprep.subr.bf16.mxu1 %v1630_v21  ;;  %v1709_v21 = vld [vmem:[#allocation8 + $0x20] ss:$8 sps:$4 sm:$0xff]  }
  0x85   :  { %956 = vmatpush1.bf16.msra.mxu0 %v1625_v22  ;;  %v1714_v22 = vld [vmem:[#allocation8 + $0x34] ss:$8 sps:$4 sm:$0xff]  }
  0x86   :  { %997 = vmatpush1.bf16.msra.mxu1 %v1628_v23  ;;  %957 = vmatprep.subr.bf16.mxu0 %v1633_v24  ;;  %v1712_v23 = vld [vmem:[#allocation8 + $0x30] ss:$8 sps:$4 sm:$0xff]   ;;  %v1717_v24 = vld [vmem:[#allocation8 + $0x44] ss:$8 sps:$4 sm:$0xff]  }
  0x87   :  { %998 = vmatprep.subr.bf16.mxu1 %v1636_v25  ;;  %v1715_v25 = vld [vmem:[#allocation8 + $0x40] ss:$8 sps:$4 sm:$0xff]  }
  0x89   :  { %958 = vmatpush1.bf16.msra.mxu0 %v1631_v26  ;;  %v1720_v26 = vld [vmem:[#allocation8 + $0x54] ss:$8 sps:$4 sm:$0xff]  }
  0x8a   :  { %999 = vmatpush1.bf16.msra.mxu1 %v1634_v27  ;;  %959 = vmatprep.subr.bf16.mxu0 %v1639_v28  ;;  %v1718_v27 = vld [vmem:[#allocation8 + $0x50] ss:$8 sps:$4 sm:$0xff]   ;;  %v1723_v28 = vld [vmem:[#allocation8 + $0x64] ss:$8 sps:$4 sm:$0xff]  }
  0x8b   :  { %1000 = vmatprep.subr.bf16.mxu1 %v1642_v29  ;;  %v1721_v29 = vld [vmem:[#allocation8 + $0x60] ss:$8 sps:$4 sm:$0xff]  }
  0x8d   :  { %960 = vmatpush1.bf16.msra.mxu0 %v1637_v30  ;;  %v1726_v30 = vld [vmem:[#allocation8 + $0x74] ss:$8 sps:$4 sm:$0xff]  }
  0x8e   :  { %1001 = vmatpush1.bf16.msra.mxu1 %v1640_v31  ;;  %961 = vmatprep.subr.bf16.mxu0 %v1645_v32  ;;  %v1724_v31 = vld [vmem:[#allocation8 + $0x70] ss:$8 sps:$4 sm:$0xff]   ;;  %v1729_v32 = vld [vmem:[#allocation8 + $0x84] ss:$8 sps:$4 sm:$0xff]  }
  0x8f   :  { %1002 = vmatprep.subr.bf16.mxu1 %v1648_v33  ;;  %v1727_v33 = vld [vmem:[#allocation8 + $0x80] ss:$8 sps:$4 sm:$0xff]  }
  0x91   :  { %962 = vmatpush1.bf16.msra.mxu0 %v1643_v34  ;;  %v1732_v34 = vld [vmem:[#allocation8 + $0x94] ss:$8 sps:$4 sm:$0xff]  }
  0x92   :  { %1003 = vmatpush1.bf16.msra.mxu1 %v1646_v35  ;;  %963 = vmatprep.subr.bf16.mxu0 %v1651_v37  ;;  %v1730_v35 = vld [vmem:[#allocation8 + $0x90] ss:$8 sps:$4 sm:$0xff]   ;;  %v1733_v37 = vld [vmem:[#allocation8 + $0xa0] ss:$8 sps:$4 sm:$0xff]  }
  0x93   :  { %1004 = vmatprep.subr.bf16.mxu1 %v1654_v38  ;;  %v1738_v38 = vld [vmem:[#allocation8 + $0xb4] ss:$8 sps:$4 sm:$0xff]  }
  0x95   :  { %964 = vmatpush1.bf16.msra.mxu0 %v1649_v42  ;;  %v1744_v42 = vld [vmem:[#allocation8 + $0xd4] ss:$8 sps:$4 sm:$0xff]  }
  0x96   :  { %1005 = vmatpush1.bf16.msra.mxu1 %v1652_v43  ;;  %965 = vmatprep.subr.bf16.mxu0 %v1657_v44  ;;  %v1742_v43 = vld [vmem:[#allocation8 + $0xd0] ss:$8 sps:$4 sm:$0xff]   ;;  %v1747_v44 = vld [vmem:[#allocation8 + $0xe4] ss:$8 sps:$4 sm:$0xff]  }
  0x97   :  { %1006 = vmatprep.subr.bf16.mxu1 %v1660_v45  ;;  %v1745_v45 = vld [vmem:[#allocation8 + $0xe0] ss:$8 sps:$4 sm:$0xff]  }
  0x99   :  { %966 = vmatpush1.bf16.msra.mxu0 %v1655_v46  ;;  %v1750_v46 = vld [vmem:[#allocation8 + $0xf4] ss:$8 sps:$4 sm:$0xff]  }
  0x9a   :  { %1007 = vmatpush1.bf16.msra.mxu1 %v1658_v47  ;;  %967 = vmatprep.subr.bf16.mxu0 %v1663_v48  ;;  %v1748_v47 = vld [vmem:[#allocation8 + $0xf0] ss:$8 sps:$4 sm:$0xff]  }
  0x9b   :  { %1008 = vmatprep.subr.bf16.mxu1 %v1666_v49 }
  0x9d   :  { %968 = vmatpush1.bf16.msra.mxu0 %v1661_v50 }
  0x9e   :  { %1009 = vmatpush1.bf16.msra.mxu1 %v1664_v51  ;;  %969 = vmatprep.subr.bf16.mxu0 %v1669_v52 }
  0x9f   :  { %1010 = vmatprep.subr.bf16.mxu1 %v1672_v53 }
  0xa1   :  { %970 = vmatpush1.bf16.msra.mxu0 %v1667_v54 }
  0xa2   :  { %1011 = vmatpush1.bf16.msra.mxu1 %v1670_v55  ;;  %971 = vmatprep.subr.bf16.mxu0 %v1675_v56 }
  0xa3   :  { %1012 = vmatprep.subr.bf16.mxu1 %v1678_v57 }
  0xa5   :  { %972 = vmatpush1.bf16.msra.mxu0 %v1673_v58  ;;  %v69_v58 = vlaneseq }
  0xa6   :  { %1013 = vmatpush1.bf16.msra.mxu1 %v1676_v59  ;;  %973 = vmatprep.subr.bf16.mxu0 %v1681_v60 }
  0xa7   :  { %1014 = vmatprep.subr.bf16.mxu1 %v1684_v61  ;;  %v70_v59 = vshrl.u32 %v69_v58, 7  ;;  %v67_v61 = vld [vmem:[%s1985_s2] sm:$0x3]  ;;  %s1874_s2 = smov [#allocation10]  }
  0xa8   :  { %s1328_s8 = sshll.u32 %s1874_s2, 4  ;;  %s1329_s8 = int_to_ptr.vmem [resolvable:$true] %s1328_s8 }
  0xa9   :  { %974 = vmatpush1.bf16.msra.mxu0 %v1679_v62  ;;  %v71_v60 = vsub.s32 0, %v70_v59  ;;  %v75_v62 = vsub.s32 1, %v70_v59  ;;  %vm1294_vm0 = vcmp.lt.s32.totalorder %v70_v59, 2  ;;  %s1817_s17 = scalar_lea.vmem %s1329_s8, 128  ;;  %p1822_p11 = scmp.lt.s32.totalorder %s1329_s8, %s1329_s8 }
  0xaa   :  { %1015 = vmatpush1.bf16.msra.mxu1 %v1682_v63  ;;  %975 = vmatprep.subr.bf16.mxu0 %v1687_v0  ;;  %p1818_p10 = scmp.ne.s32.totalorder %s1329_s8, %s1817_s17  ;;  %p1823_p12 = scmp.lt.s32.totalorder %s1817_s17, %s1817_s17 }
  0xab   :  { %1016 = vmatprep.subr.bf16.mxu1 %v1690_v1 }
  0xac   :  { %p1824_p13 = por %p1823_p12, %p1822_p11 }
  0xad   :  { %976 = vmatpush1.bf16.msra.mxu0 %v1685_v2  ;;  %v72_v2 = vrot.slane %v67_v61, %v71_v60 }
  0xae   :  { %1017 = vmatpush1.bf16.msra.mxu1 %v1688_v3  ;;  %977 = vmatprep.subr.bf16.mxu0 %v1693_v4  ;;  %p1825_p0 = pnand %p1824_p13, %p1818_p10 }
  0xaf   :  { %1018 = vmatprep.subr.bf16.mxu1 %v1696_v5 }
  0xb1   :  { %978 = vmatpush1.bf16.msra.mxu0 %v1691_v6  ;;  %v76_v6 = vrot.slane %v67_v61, %v75_v62 }
  0xb2   :  { %1019 = vmatpush1.bf16.msra.mxu1 %v1694_v7  ;;  %979 = vmatprep.subr.bf16.mxu0 %v1699_v8 }
  0xb3   :  { %1020 = vmatprep.subr.bf16.mxu1 %v1702_v9 }
  0xb5   :  { %980 = vmatpush1.bf16.msra.mxu0 %v1697_v10 }
  0xb6   :  { %1021 = vmatpush1.bf16.msra.mxu1 %v1700_v11  ;;  %1246 = vmatprep.subr.bf16.mxu0 %v1705_v17 }
  0xb8   :  { %982 = vmatmul.mubr.bf16.vlgmr.msra.gmra.mrb[4].mxu0 %v95_v14 }
  0xb9   :  { %1023 = vmatmul.mubr.bf16.vlgmr.msra.gmra.mrb[4].mxu1 %v97_v15  ;;  %1247 = vmatpush1.bf16.msra.mxu0 %v1703_v16 }
  0xba   :  { %1248 = vmatprep.subr.bf16.mxu0 %v1708_v18 }
  0xbd   :  { %1249 = vmatpush1.bf16.msra.mxu0 %v1706_v19 }
  0xbe   :  { %1250 = vmatprep.subr.bf16.mxu0 %v1711_v20 }
  0xc1   :  { %1251 = vmatpush1.bf16.msra.mxu0 %v1709_v21 }
  0xc2   :  { %1252 = vmatprep.subr.bf16.mxu0 %v1714_v22 }
  0xc5   :  { %1253 = vmatpush1.bf16.msra.mxu0 %v1712_v23 }
  0xc6   :  { %1254 = vmatprep.subr.bf16.mxu0 %v1717_v24 }
  0xc9   :  { %1255 = vmatpush1.bf16.msra.mxu0 %v1715_v25 }
  0xca   :  { %1256 = vmatprep.subr.bf16.mxu0 %v1720_v26 }
  0xcd   :  { %1257 = vmatpush1.bf16.msra.mxu0 %v1718_v27 }
  0xce   :  { %1258 = vmatprep.subr.bf16.mxu0 %v1723_v28 }
  0xd1   :  { %1259 = vmatpush1.bf16.msra.mxu0 %v1721_v29  ;;  %v1074_v29 = vld [vmem:[%s1987_s4] sm:$0x3] }
  0xd2   :  { %1260 = vmatprep.subr.bf16.mxu0 %v1726_v30 }
  0xd5   :  { %1261 = vmatpush1.bf16.msra.mxu0 %v1724_v31  ;;  %v1079_v31 = vrot.slane %v1074_v29, %v71_v60 }
  0xd6   :  { %1262 = vmatprep.subr.bf16.mxu0 %v1729_v32  ;;  %v1083_v32 = vrot.slane %v1074_v29, %v75_v62 }
  0xd9   :  { %1263 = vmatpush1.bf16.msra.mxu0 %v1727_v33 }
  0xda   :  { %1264 = vmatprep.subr.bf16.mxu0 %v1732_v34 }
  0xdd   :  { %1265 = vmatpush1.bf16.msra.mxu0 %v1730_v35 }
  0xde   :  { %1266 = vmatprep.subr.bf16.mxu0 %v1735_v36 }
  0xe1   :  { %1267 = vmatpush1.bf16.msra.mxu0 %v1733_v37 }
  0xe2   :  { %1268 = vmatprep.subr.bf16.mxu0 %v1738_v38 }
  0xe5   :  { %1269 = vmatpush1.bf16.msra.mxu0 %v1736_v39 }
  0xe6   :  { %1270 = vmatprep.subr.bf16.mxu0 %v1741_v40 }
  0xe9   :  { %1271 = vmatpush1.bf16.msra.mxu0 %v1739_v41 }
  0xea   :  { %1272 = vmatprep.subr.bf16.mxu0 %v1744_v42 }
  0xed   :  { %1273 = vmatpush1.bf16.msra.mxu0 %v1742_v43 }
  0xee   :  { %1274 = vmatprep.subr.bf16.mxu0 %v1747_v44 }
  0xf1   :  { %1275 = vmatpush1.bf16.msra.mxu0 %v1745_v45 }
  0xf2   :  { %1276 = vmatprep.subr.bf16.mxu0 %v1750_v46 }
  0xf5   :  { %1277 = vmatpush1.bf16.msra.mxu0 %v1748_v47 }
 0x14b   :  { %v901_v48 = vpop.f32.mrb[0].mxu0 }
 0x14c   :  { %v942_v49 = vpop.f32.mrb[0].mxu1  ;;  %v903_v51 = vpop.f32.mrb[1].mxu0 }
 0x14d   :  { %v943_v50 = vadd.f32 %v942_v49, %v901_v48  ;;  %v944_v52 = vpop.f32.mrb[1].mxu1  ;;  %v905_v54 = vpop.f32.mrb[2].mxu0 }
 0x14e   :  { %v945_v53 = vadd.f32 %v944_v52, %v903_v51  ;;  %v946_v55 = vpop.f32.mrb[2].mxu1  ;;  %v906_v56 = vpop.f32.mrb[3].mxu0 }
 0x14f   :  { %v947_v57 = vpop.f32.mrb[3].mxu1 }
 0x18b   :  { %v983_v63 = vpop.f32.mrb[4].mxu0 }
 0x18c   :  { %v1024_v0 = vpop.f32.mrb[4].mxu1  ;;  %v984_v1 = vadd.f32 %v983_v63, %v943_v50  ;;  %v985_v3 = vpop.f32.mrb[5].mxu0 }
 0x18d   :  { %v1026_v4 = vpop.f32.mrb[5].mxu1  ;;  %v986_v5 = vadd.f32 %v985_v3, %v945_v53  ;;  %v987_v7 = vpop.f32.mrb[6].mxu0 }
 0x18e   :  { %v1028_v8 = vpop.f32.mrb[6].mxu1  ;;  %v1025_v9 = vadd.f32 %v1024_v0, %v984_v1  ;;  %v988_v10 = vpop.f32.mrb[7].mxu0 }
 0x18f   :  { %v1029_v11 = vpop.f32.mrb[7].mxu1  ;;  %v1027_v12 = vadd.f32 %v1026_v4, %v986_v5 }
 0x190   :  { %v1031_v13 = vadd.f32 %v1025_v9, %v72_v2 }
 0x191   :  { %v1032_v14 = vadd.f32 %v1027_v12, %v76_v6 }
 0x192   :  { %v1295_v15 = vmul.f32 %v1031_v13, %v1031_v13  ;;  %v1040_v18 = vpack.c.bf16 %v1031_v13, %v1031_v13 }
 0x193   :  { %v1041_v16 = vpack.c.bf16 %v1032_v14, %v1032_v14  ;;  %v1296_v17 = vmul.f32 %v1032_v14, %v1032_v14 }
 0x194   :  { %v1297_v19 = vsel %vm1294_vm0, %v1295_v15, 0.0 }
 0x195   :  { %1278 = vmatprep.mubr.bf16.mxu0 %v1041_v16  ;;  %v1298_v20 = vsel %vm1294_vm0, %v1296_v17, 0.0 }
 0x196   :  { %1279 = vmatmul.mubr.bf16.vlgmr.msra.gmra.mrb[8].mxu0 %v1040_v18  ;;  %v1299_v21 = vadd.f32 %v1298_v20, %v1297_v19 }
 0x198   :  { %1300 = vadd.xlane.f32.xlu0 %v1299_v21 }
 0x225   :  { %v1301_v22 = vpop.xlane.xlu0 %1300 }
 0x226   :  { %v1302_v23 = vrot.slane %v1301_v22, 4 }
 0x228   :  { %v1303_v24 = vadd.f32 %v1302_v23, %v1301_v22 }
 0x22a   :  { %v1304_v25 = vrot.slane %v1303_v24, 2 }
 0x22c   :  { %v1305_v26 = vadd.f32 %v1304_v25, %v1303_v24 }
 0x22e   :  { %v1306_v27 = vrot.slane %v1305_v26, 1 }
 0x230   :  { %v1307_v28 = vadd.f32 %v1306_v27, %v1305_v26 }
 0x232   :  { %1502 = vpush %v1307_v28 }
 0x263   :  { %s1503_s11 = spop %1502 }
 0x264   :  { %s1309_s14 = smul.f32 0.015625, %s1503_s11 }
 0x266   :  { %v1310_v30 = vstv %s1309_s14 }
 0x267   :  { %1311 = vst [vmem:[#allocation10] sm:$0xff] %v1310_v30 }
 0x268   :  { %1828 = shalt.err (!%p1825_p0)
}
 0x269   :  { %s1829_s20 = scalar_lea.hbm %s1989_s6, 128 }
 0x26a   :  { %p1830_p1 = scmp.ne.s32.totalorder %s1989_s6, %s1829_s20  ;;  %p1833_p2 = scmp.lt.u32.totalorder %s1829_s20, %s1989_s6 }
 0x26c   :  { %p1835_p3 = pnand %p1833_p2, %p1830_p1 }
 0x26e   :  { %1838 = shalt.err (!%p1835_p3)
}
 0x26f   :  { %1331 = dma.vmem_to_hbm [thread:$0]  %s1329_s8, 128, %s1989_s6, [#allocation11]   ;;  %v1280_v33 = vpop.f32.mrb[8].mxu0 }
 0x270   :  { %v1281_v34 = vadd.f32 %v1280_v33, %v1079_v31  ;;  %v1282_v35 = vpop.f32.mrb[9].mxu0  ;;  %s1839_s25 = scalar_lea.vmem %s1319_s16, 256  ;;  %p1844_p5 = scmp.lt.s32.totalorder %s1319_s16, %s1319_s16 }
 0x271   :  { %v1283_v36 = vadd.f32 %v1282_v35, %v1083_v32  ;;  %v1284_v37 = vpop.f32.mrb[10].mxu0  ;;  %p1840_p4 = scmp.ne.s32.totalorder %s1319_s16, %s1839_s25  ;;  %p1845_p6 = scmp.lt.s32.totalorder %s1839_s25, %s1839_s25 }
 0x272   :  { %1287 = vst [vmem:[#allocation9] sm:$0xff] %v1281_v34  ;;  %v1285_v38 = vpop.f32.mrb[11].mxu0 }
 0x273   :  { %1288 = vst [vmem:[#allocation9 + $0x8] sm:$0xff] %v1283_v36  ;;  %p1846_p7 = por %p1845_p6, %p1844_p5 }
 0x275   :  { %p1847_p8 = pnand %p1846_p7, %p1840_p4 }
 0x277   :  { %1850 = shalt.err (!%p1847_p8)
}
 0x278   :  { %s1851_s6 = scalar_lea.hbm %s1988_s5, 256 }
 0x279   :  { %p1852_p9 = scmp.ne.s32.totalorder %s1988_s5, %s1851_s6  ;;  %p1855_p10 = scmp.lt.u32.totalorder %s1851_s6, %s1988_s5 }
 0x27b   :  { %p1857_p11 = pnand %p1855_p10, %p1852_p9 }
 0x27d   :  { %1860 = shalt.err (!%p1857_p11)
}
 0x27e   :  { %1321 = dma.vmem_to_hbm [thread:$0]  %s1319_s16, 256, %s1988_s5, [#allocation5]  }
 0x27f   :  { %1865 = dma.done.wait [#allocation5], 256  }
 0x280   :  { %1866 = vsyncadd [#allocation5], 4294967040 }
 0x281   :  { %1867 = dma.done.wait [#allocation11], 128  }
 0x282   :  { %1868 = vsyncadd [#allocation11], 4294967168 }
 0x283   :  { %1338 = vsyncpa [#allocation4], 1 }
 0x284   :  { %1339 = vsyncpa [#allocation7], 1 }
 0x285   :  { %1340 = vsyncpa [#allocation5], 1 }
 0x286   :  { %1341 = vsyncpa [#allocation11], 1 }

</bundles_post_ra>
